<compile_context>
chip_gen: v7x
topology: tpu7x:2x2x1
jax: 0.10.0
libtpu: 0.0.40
codegen_flags: <defaults>
</compile_context>

<pallas_src>
import jax
import jax.numpy as jnp
from jax import lax
from jax.experimental import pallas as pl
from jax.experimental.pallas import tpu as pltpu

MAX_USER = 10000
MAX_ITEM = 10000
MAX_CAT = 10
HID = 16             # GRU hidden / embedding / attention dim
OUT_PAD = 128        # lane-padded logits width (2 real lanes + 126 masked)
NEG = -1e30          # softmax mask value for the padded logit lanes
FULL_UNROLL_T = 8    # fully unroll the recurrence for T <= this
GI_CHUNK_ROWS = 128  # rows per hoisted-projection chunk (bounds vreg pressure)

# ---- Packed parameter slab layout (rows x 128 lanes; every start 8-aligned).
ROW_GRU_WI = 0       # (16, 48)
ROW_GRU_WH = 16      # (16, 48)
ROW_GRU_B = 32       # (2, 48): row 0 = b_ih, row 1 = b_hh
ROW_ATTN_W = 40      # (16, 16)  folded Wv @ Wo
ROW_ATTN_B = 56      # (1, 16)   folded bv @ Wo + bo
ROW_BN1 = 64         # (2, 48): gamma, beta
ROW_FC1_W = 72       # (48, 16)
ROW_FC1_B = 120      # (1, 16)
ROW_BN2 = 128        # (2, 16): gamma, beta
ROW_FC2_W = 136      # (16, OUT_PAD) zero-padded beyond lane 2
ROW_FC2_B = 152      # (1, OUT_PAD)  NEG beyond lane 2
SLAB_ROWS = 160
SLAB_COLS = 128


def ranking_kernel(user_ref, hist_ref, tgt_ref, slab_ref, out_ref, gi_scratch):
    H = HID
    B = user_ref.shape[0]
    TB = hist_ref.shape[0]
    T = TB // B

    tgt = tgt_ref[...]              # (B, 16)
    user = user_ref[...]            # (B, 16)

    # ---- Attention context (length-1 key => softmax == 1; V/O folded offline).
    w_attn = slab_ref[ROW_ATTN_W:ROW_ATTN_W + H, 0:H]
    b_attn = slab_ref[ROW_ATTN_B:ROW_ATTN_B + 1, 0:H]
    attn_ctx = jnp.dot(tgt, w_attn, preferred_element_type=jnp.float32) + b_attn

    # ---- GRU encoder (PyTorch gate order r, z, n); input projection hoisted.
    wi = slab_ref[ROW_GRU_WI:ROW_GRU_WI + H, 0:3 * H]
    wh = slab_ref[ROW_GRU_WH:ROW_GRU_WH + H, 0:3 * H]
    b_i = slab_ref[ROW_GRU_B:ROW_GRU_B + 1, 0:3 * H]
    b_h = slab_ref[ROW_GRU_B + 1:ROW_GRU_B + 2, 0:3 * H]

    h = jnp.zeros((B, H), jnp.float32)       # carried in vregs
    h_sum = jnp.zeros((B, H), jnp.float32)   # running sum_t h_t

    def gru_step(gi, h, h_sum):
        gh = jnp.dot(h, wh, preferred_element_type=jnp.float32) + b_h
        r = jax.nn.sigmoid(gi[:, 0:H] + gh[:, 0:H])
        z = jax.nn.sigmoid(gi[:, H:2 * H] + gh[:, H:2 * H])
        n = jnp.tanh(gi[:, 2 * H:3 * H] + r * gh[:, 2 * H:3 * H])
        h_new = (1.0 - z) * n + z * h
        return h_new, h_sum + h_new

    # TODO(synk): once B spans multiple sublane tiles (batch grid), interleave
    # 2-4 independent per-tile GRU chains here to fill MXU/EUP latency bubbles.
    if T <= FULL_UNROLL_T:
        # Small T: one hoisted matmul, register-resident gi, full static unroll.
        gi_all = jnp.dot(hist_ref[...], wi,
                         preferred_element_type=jnp.float32) + b_i      # (T*B, 48)
        for t in range(T):
            h, h_sum = gru_step(gi_all[t * B:(t + 1) * B, :], h, h_sum)
    else:
        # Large T: hoisted projection written to VMEM scratch in bounded
        # chunks, recurrence as a fori_loop with small unroll (no vreg blow-up).
        for lo in range(0, TB, GI_CHUNK_ROWS):
            hi = min(TB, lo + GI_CHUNK_ROWS)
            gi_scratch[lo:hi, :] = jnp.dot(
                hist_ref[lo:hi, :], wi,
                preferred_element_type=jnp.float32) + b_i

        def body(t, carry):
            h, h_sum = carry
            off = pl.multiple_of(t * B, B)
            gi = gi_scratch[pl.ds(off, B), :]
            return gru_step(gi, h, h_sum)

        h, h_sum = lax.fori_loop(0, T, body, (h, h_sum), unroll=2)

    # avg = sum_t (attn_ctx * h_t) = attn_ctx * sum_t h_t
    # (reference does attention.sum(axis=1): a SUM over time -> no 1/T factor)
    avg = attn_ctx * h_sum                                               # (B, 16)

    all_enc = jnp.concatenate([avg, tgt, user], axis=1)                  # (B, 48)

    # ---- fc_layers: BN(48) -> Linear(48,16) -> ReLU -> BN(16) -> Linear(16,2)
    #      -> softmax.  BN in training mode (batch stats, biased variance).
    eps = 1e-5
    g1 = slab_ref[ROW_BN1:ROW_BN1 + 1, 0:3 * H]
    beta1 = slab_ref[ROW_BN1 + 1:ROW_BN1 + 2, 0:3 * H]
    m1 = jnp.mean(all_enc, axis=0, keepdims=True)
    v1 = jnp.mean((all_enc - m1) ** 2, axis=0, keepdims=True)
    x1 = (all_enc - m1) * lax.rsqrt(v1 + eps) * g1 + beta1

    fc1_w = slab_ref[ROW_FC1_W:ROW_FC1_W + 3 * H, 0:H]
    fc1_b = slab_ref[ROW_FC1_B:ROW_FC1_B + 1, 0:H]
    h1 = jnp.maximum(
        jnp.dot(x1, fc1_w, preferred_element_type=jnp.float32) + fc1_b, 0.0)

    g2 = slab_ref[ROW_BN2:ROW_BN2 + 1, 0:H]
    beta2 = slab_ref[ROW_BN2 + 1:ROW_BN2 + 2, 0:H]
    m2 = jnp.mean(h1, axis=0, keepdims=True)
    v2 = jnp.mean((h1 - m2) ** 2, axis=0, keepdims=True)
    x2 = (h1 - m2) * lax.rsqrt(v2 + eps) * g2 + beta2

    # Lane-padded logits: padded weight columns are 0 and padded bias lanes are
    # NEG, so softmax assigns them exactly 0 and the output store is unmasked.
    fc2_w = slab_ref[ROW_FC2_W:ROW_FC2_W + H, 0:OUT_PAD]
    fc2_b = slab_ref[ROW_FC2_B:ROW_FC2_B + 1, 0:OUT_PAD]
    logits = jnp.dot(x2, fc2_w, preferred_element_type=jnp.float32) + fc2_b
    m = jnp.max(logits, axis=-1, keepdims=True)
    e = jnp.exp(logits - m)
    out_ref[...] = e / jnp.sum(e, axis=-1, keepdims=True)


def ranking_forward(user_emb, history_emb_tmajor, target_emb, param_slab):
    T, B, _ = history_emb_tmajor.shape
    # Pre-flatten to (T*B, 16) so the hoisted input-projection matmul needs no
    # in-kernel reshape (each (B,16) time-step block is a sublane-aligned slice).
    hist2d = history_emb_tmajor.reshape(T * B, HID)
    operands = (user_emb, hist2d, target_emb, param_slab)
    out_padded = pl.pallas_call(
        ranking_kernel,
        out_shape=jax.ShapeDtypeStruct((B, OUT_PAD), jnp.float32),
        in_specs=[pl.BlockSpec(memory_space=pltpu.MemorySpace.VMEM)
                  for _ in operands],
        out_specs=pl.BlockSpec(memory_space=pltpu.MemorySpace.VMEM),
        scratch_shapes=[pltpu.VMEM((T * B, 3 * HID), jnp.float32)],
    )(*operands)
    return out_padded[:, :2]


def init_params(key):
    ks = jax.random.split(key, 16)

    def nrm(k, shape, scale=0.1):
        return (scale * jax.random.normal(k, shape)).astype(jnp.float32)

    p = {}
    # Embedding tables
    p['user_table'] = nrm(ks[0], (MAX_USER, 16))
    p['item_table'] = nrm(ks[1], (MAX_ITEM, 12))
    p['cat_table'] = nrm(ks[2], (MAX_CAT, 4))
    # GRU (torch layout (3H, in), gate order r,z,n) -> transposed to (in, 3H)
    p['gru_wi'] = nrm(ks[3], (3 * HID, 16)).T
    p['gru_wh'] = nrm(ks[4], (3 * HID, HID)).T
    p['gru_b'] = jnp.stack([nrm(ks[5], (3 * HID,)), nrm(ks[6], (3 * HID,))])  # (2, 48)
    # MultiheadAttention in_proj (3E, E) order q,k,v -> transposed; out_proj (E, E)
    p['attn_wqkv'] = nrm(ks[7], (3 * HID, HID)).T
    p['attn_bqkv'] = nrm(ks[8], (3 * HID,)).reshape(1, 3 * HID)
    p['attn_wo'] = nrm(ks[9], (HID, HID)).T
    p['attn_bo'] = nrm(ks[10], (HID,)).reshape(1, HID)
    # fc_layers
    p['bn1'] = jnp.stack([jnp.ones((48,), jnp.float32), jnp.zeros((48,), jnp.float32)])
    p['fc1_w'] = nrm(ks[11], (16, 48)).T
    p['fc1_b'] = nrm(ks[12], (16,)).reshape(1, 16)
    p['bn2'] = jnp.stack([jnp.ones((16,), jnp.float32), jnp.zeros((16,), jnp.float32)])
    p['fc2_w'] = nrm(ks[13], (2, 16)).T
    p['fc2_b'] = nrm(ks[14], (2,)).reshape(1, 2)
    return p


def pack_params(p):
    """Fold attention V/O projections and pack all kernel params into one slab."""
    H = HID
    # [2] Fold attention value/output projections at parameter time (exact:
    # softmax over the length-1 key == 1, so ctx = (tgt @ Wv + bv) @ Wo + bo).
    w_attn = p['attn_wqkv'][:, 2 * H:3 * H] @ p['attn_wo']                    # (16, 16)
    b_attn = p['attn_bqkv'][:, 2 * H:3 * H] @ p['attn_wo'] + p['attn_bo']     # (1, 16)

    # [8] Lane-pad fc2 so the kernel emits (B, OUT_PAD) unmasked stores.
    fc2_w = jnp.zeros((H, OUT_PAD), jnp.float32).at[:, :2].set(p['fc2_w'])
    fc2_b = jnp.full((1, OUT_PAD), NEG, jnp.float32).at[:, :2].set(p['fc2_b'])

    slab = jnp.zeros((SLAB_ROWS, SLAB_COLS), jnp.float32)

    def put(s, row, x):
        x = jnp.asarray(x, jnp.float32)
        if x.ndim == 1:
            x = x[None, :]
        return s.at[row:row + x.shape[0], :x.shape[1]].set(x)

    slab = put(slab, ROW_GRU_WI, p['gru_wi'])
    slab = put(slab, ROW_GRU_WH, p['gru_wh'])
    slab = put(slab, ROW_GRU_B, p['gru_b'])
    slab = put(slab, ROW_ATTN_W, w_attn)
    slab = put(slab, ROW_ATTN_B, b_attn)
    slab = put(slab, ROW_BN1, p['bn1'])
    slab = put(slab, ROW_FC1_W, p['fc1_w'])
    slab = put(slab, ROW_FC1_B, p['fc1_b'])
    slab = put(slab, ROW_BN2, p['bn2'])
    slab = put(slab, ROW_FC2_W, fc2_w)
    slab = put(slab, ROW_FC2_B, fc2_b)
    return slab


def ranking_reference(user_emb, history_emb_tmajor, target_emb, p):
    """Pure-JAX reference of the same forward semantics (wiring sanity check)."""
    T, B, _ = history_emb_tmajor.shape
    H = HID
    wv = p['attn_wqkv'][:, 2 * H:3 * H]
    bv = p['attn_bqkv'][:, 2 * H:3 * H]
    attn_ctx = (target_emb @ wv + bv) @ p['attn_wo'] + p['attn_bo']
    b_i, b_h = p['gru_b'][0], p['gru_b'][1]
    h = jnp.zeros((B, H), jnp.float32)
    h_sum = jnp.zeros((B, H), jnp.float32)
    for t in range(T):
        gi = history_emb_tmajor[t] @ p['gru_wi'] + b_i
        gh = h @ p['gru_wh'] + b_h
        r = jax.nn.sigmoid(gi[:, :H] + gh[:, :H])
        z = jax.nn.sigmoid(gi[:, H:2 * H] + gh[:, H:2 * H])
        n = jnp.tanh(gi[:, 2 * H:] + r * gh[:, 2 * H:])
        h = (1.0 - z) * n + z * h
        h_sum = h_sum + h
    avg = attn_ctx * h_sum
    x = jnp.concatenate([avg, target_emb, user_emb], axis=1)
    eps = 1e-5

    def bn(x, gb):
        m = jnp.mean(x, axis=0, keepdims=True)
        v = jnp.mean((x - m) ** 2, axis=0, keepdims=True)
        return (x - m) * lax.rsqrt(v + eps) * gb[0] + gb[1]

    x = bn(x, p['bn1'])
    x = jnp.maximum(x @ p['fc1_w'] + p['fc1_b'], 0.0)
    x = bn(x, p['bn2'])
    logits = x @ p['fc2_w'] + p['fc2_b']
    return jax.nn.softmax(logits, axis=-1)


if __name__ == "__main__":
    key = jax.random.PRNGKey(0)
    pkey, dkey = jax.random.split(key)
    params = init_params(pkey)
    slab = pack_params(params)

    B = 8
    # T=8 exercises the fully-unrolled path; T=50 (the reference history
    # length) exercises the fori_loop + VMEM gi-scratch path.
    for T in (8, 50):
        k1, k2, k3, k4, k5 = jax.random.split(jax.random.fold_in(dkey, T), 5)
        user_id = jax.random.randint(k1, (B,), 0, MAX_USER)
        history_item_id = jax.random.randint(k2, (B, T), 0, MAX_ITEM)
        history_category_id = jax.random.randint(k3, (B, T), 0, MAX_CAT)
        target_item_id = jax.random.randint(k4, (B,), 0, MAX_ITEM)
        target_category_id = jax.random.randint(k5, (B,), 0, MAX_CAT)

        # Glue: embedding gathers + concat + time-major transpose (plain JAX).
        user_emb = params['user_table'][user_id]                              # (B, 16)
        history_emb = jnp.concatenate(
            [params['item_table'][history_item_id],
             params['cat_table'][history_category_id]], axis=-1)              # (B, T, 16)
        history_emb_tm = jnp.transpose(history_emb, (1, 0, 2))                # (T, B, 16)
        target_emb = jnp.concatenate(
            [params['item_table'][target_item_id],
             params['cat_table'][target_category_id]], axis=-1)               # (B, 16)

        out = ranking_forward(user_emb, history_emb_tm, target_emb, slab)
        out = jax.block_until_ready(out)

        assert out.shape == (B, 2)
        assert bool(jnp.all(jnp.isfinite(out)))
        # rows should sum to 1 after softmax
        assert bool(jnp.all(jnp.abs(jnp.sum(out, axis=-1) - 1.0) < 1e-5))

        # Loose wiring-sanity bound vs the pure-JAX reference (MXU f32 matmul
        # precision passes may differ slightly from XLA's reference dots).
        ref = ranking_reference(user_emb, history_emb_tm, target_emb, params)
        assert bool(jnp.max(jnp.abs(out - ref)) < 2e-2)

    print("KERNEL_OK")
</pallas_src>

<mosaic_0001>
module attributes {stable_mosaic.version = 11 : i64} {
  func.func @ranking_kernel(%arg0: memref<8x16xf32, #tpu.memory_space<vmem>>, %arg1: memref<64x16xf32, #tpu.memory_space<vmem>>, %arg2: memref<8x16xf32, #tpu.memory_space<vmem>>, %arg3: memref<160x128xf32, #tpu.memory_space<vmem>>, %arg4: memref<8x128xf32, #tpu.memory_space<vmem>>, %arg5: memref<64x48xf32, #tpu.memory_space<vmem>>) attributes {dimension_semantics = [], scalar_prefetch = 0 : i64, scratch_operands = 1 : i64, tpu.core_type = #tpu.core_type<tc>} {
    %c0 = arith.constant 0 : index
    %c0_0 = arith.constant 0 : index
    %0 = vector.load %arg2[%c0, %c0_0] : memref<8x16xf32, #tpu.memory_space<vmem>>, vector<8x16xf32>
    %c0_1 = arith.constant 0 : index
    %c0_2 = arith.constant 0 : index
    %1 = vector.load %arg0[%c0_1, %c0_2] : memref<8x16xf32, #tpu.memory_space<vmem>>, vector<8x16xf32>
    %c40 = arith.constant 40 : index
    %c0_3 = arith.constant 0 : index
    %2 = vector.load %arg3[%c40, %c0_3] : memref<160x128xf32, #tpu.memory_space<vmem>>, vector<16x16xf32>
    %c56 = arith.constant 56 : index
    %c0_4 = arith.constant 0 : index
    %3 = vector.load %arg3[%c56, %c0_4] : memref<160x128xf32, #tpu.memory_space<vmem>>, vector<1x16xf32>
    %cst = arith.constant dense<0.000000e+00> : vector<8x16xf32>
    %4 = tpu.matmul %0, %2, %cst {dimension_numbers = #tpu.dot_dimension_numbers<[1], [0], [0], [1], [0, 0, 1, 1], [], []>} : vector<8x16xf32>, vector<16x16xf32>, vector<8x16xf32> -> vector<8x16xf32>
    %5 = vector.broadcast %3 : vector<1x16xf32> to vector<8x16xf32>
    %6 = arith.addf %4, %5 : vector<8x16xf32>
    %c0_5 = arith.constant 0 : index
    %c0_6 = arith.constant 0 : index
    %7 = vector.load %arg3[%c0_5, %c0_6] : memref<160x128xf32, #tpu.memory_space<vmem>>, vector<16x48xf32>
    %c16 = arith.constant 16 : index
    %c0_7 = arith.constant 0 : index
    %8 = vector.load %arg3[%c16, %c0_7] : memref<160x128xf32, #tpu.memory_space<vmem>>, vector<16x48xf32>
    %c32 = arith.constant 32 : index
    %c0_8 = arith.constant 0 : index
    %9 = vector.load %arg3[%c32, %c0_8] : memref<160x128xf32, #tpu.memory_space<vmem>>, vector<1x48xf32>
    %c33 = arith.constant 33 : index
    %c0_9 = arith.constant 0 : index
    %10 = vector.load %arg3[%c33, %c0_9] : memref<160x128xf32, #tpu.memory_space<vmem>>, vector<1x48xf32>
    %cst_10 = arith.constant 0.000000e+00 : f32
    %11 = vector.broadcast %cst_10 : f32 to vector<8x16xf32>
    %cst_11 = arith.constant 0.000000e+00 : f32
    %12 = vector.broadcast %cst_11 : f32 to vector<8x16xf32>
    %c0_12 = arith.constant 0 : index
    %c0_13 = arith.constant 0 : index
    %13 = vector.load %arg1[%c0_12, %c0_13] : memref<64x16xf32, #tpu.memory_space<vmem>>, vector<64x16xf32>
    %cst_14 = arith.constant dense<0.000000e+00> : vector<64x48xf32>
    %14 = tpu.matmul %13, %7, %cst_14 {dimension_numbers = #tpu.dot_dimension_numbers<[1], [0], [0], [1], [0, 0, 1, 1], [], []>} : vector<64x16xf32>, vector<16x48xf32>, vector<64x48xf32> -> vector<64x48xf32>
    %15 = vector.broadcast %9 : vector<1x48xf32> to vector<64x48xf32>
    %16 = arith.addf %14, %15 : vector<64x48xf32>
    %17 = vector.extract_strided_slice %16 {offsets = [0, 0], sizes = [8, 48], strides = [1, 1]} : vector<64x48xf32> to vector<8x48xf32>
    %cst_15 = arith.constant dense<0.000000e+00> : vector<8x48xf32>
    %18 = tpu.matmul %11, %8, %cst_15 {dimension_numbers = #tpu.dot_dimension_numbers<[1], [0], [0], [1], [0, 0, 1, 1], [], []>} : vector<8x16xf32>, vector<16x48xf32>, vector<8x48xf32> -> vector<8x48xf32>
    %19 = vector.broadcast %10 : vector<1x48xf32> to vector<8x48xf32>
    %20 = arith.addf %18, %19 : vector<8x48xf32>
    %21 = vector.extract_strided_slice %17 {offsets = [0, 0], sizes = [8, 16], strides = [1, 1]} : vector<8x48xf32> to vector<8x16xf32>
    %22 = vector.extract_strided_slice %20 {offsets = [0, 0], sizes = [8, 16], strides = [1, 1]} : vector<8x48xf32> to vector<8x16xf32>
    %23 = arith.addf %21, %22 : vector<8x16xf32>
    %24 = arith.negf %23 : vector<8x16xf32>
    %25 = math.exp %24 : vector<8x16xf32>
    %cst_16 = arith.constant 1.000000e+00 : f32
    %26 = vector.broadcast %cst_16 : f32 to vector<8x16xf32>
    %27 = arith.addf %26, %25 : vector<8x16xf32>
    %28 = arith.divf %26, %27 : vector<8x16xf32>
    %29 = vector.extract_strided_slice %17 {offsets = [0, 16], sizes = [8, 16], strides = [1, 1]} : vector<8x48xf32> to vector<8x16xf32>
    %30 = vector.extract_strided_slice %20 {offsets = [0, 16], sizes = [8, 16], strides = [1, 1]} : vector<8x48xf32> to vector<8x16xf32>
    %31 = arith.addf %29, %30 : vector<8x16xf32>
    %32 = arith.negf %31 : vector<8x16xf32>
    %33 = math.exp %32 : vector<8x16xf32>
    %cst_17 = arith.constant 1.000000e+00 : f32
    %34 = vector.broadcast %cst_17 : f32 to vector<8x16xf32>
    %35 = arith.addf %34, %33 : vector<8x16xf32>
    %36 = arith.divf %34, %35 : vector<8x16xf32>
    %37 = vector.extract_strided_slice %17 {offsets = [0, 32], sizes = [8, 16], strides = [1, 1]} : vector<8x48xf32> to vector<8x16xf32>
    %38 = vector.extract_strided_slice %20 {offsets = [0, 32], sizes = [8, 16], strides = [1, 1]} : vector<8x48xf32> to vector<8x16xf32>
    %39 = arith.mulf %28, %38 : vector<8x16xf32>
    %40 = arith.addf %37, %39 : vector<8x16xf32>
    %41 = math.tanh %40 : vector<8x16xf32>
    %cst_18 = arith.constant 1.000000e+00 : f32
    %42 = vector.broadcast %cst_18 : f32 to vector<8x16xf32>
    %43 = arith.subf %42, %36 : vector<8x16xf32>
    %44 = arith.mulf %43, %41 : vector<8x16xf32>
    %45 = arith.mulf %36, %11 : vector<8x16xf32>
    %46 = arith.addf %44, %45 : vector<8x16xf32>
    %47 = arith.addf %12, %46 : vector<8x16xf32>
    %48 = vector.extract_strided_slice %16 {offsets = [8, 0], sizes = [8, 48], strides = [1, 1]} : vector<64x48xf32> to vector<8x48xf32>
    %cst_19 = arith.constant dense<0.000000e+00> : vector<8x48xf32>
    %49 = tpu.matmul %46, %8, %cst_19 {dimension_numbers = #tpu.dot_dimension_numbers<[1], [0], [0], [1], [0, 0, 1, 1], [], []>} : vector<8x16xf32>, vector<16x48xf32>, vector<8x48xf32> -> vector<8x48xf32>
    %50 = vector.broadcast %10 : vector<1x48xf32> to vector<8x48xf32>
    %51 = arith.addf %49, %50 : vector<8x48xf32>
    %52 = vector.extract_strided_slice %48 {offsets = [0, 0], sizes = [8, 16], strides = [1, 1]} : vector<8x48xf32> to vector<8x16xf32>
    %53 = vector.extract_strided_slice %51 {offsets = [0, 0], sizes = [8, 16], strides = [1, 1]} : vector<8x48xf32> to vector<8x16xf32>
    %54 = arith.addf %52, %53 : vector<8x16xf32>
    %55 = arith.negf %54 : vector<8x16xf32>
    %56 = math.exp %55 : vector<8x16xf32>
    %cst_20 = arith.constant 1.000000e+00 : f32
    %57 = vector.broadcast %cst_20 : f32 to vector<8x16xf32>
    %58 = arith.addf %57, %56 : vector<8x16xf32>
    %59 = arith.divf %57, %58 : vector<8x16xf32>
    %60 = vector.extract_strided_slice %48 {offsets = [0, 16], sizes = [8, 16], strides = [1, 1]} : vector<8x48xf32> to vector<8x16xf32>
    %61 = vector.extract_strided_slice %51 {offsets = [0, 16], sizes = [8, 16], strides = [1, 1]} : vector<8x48xf32> to vector<8x16xf32>
    %62 = arith.addf %60, %61 : vector<8x16xf32>
    %63 = arith.negf %62 : vector<8x16xf32>
    %64 = math.exp %63 : vector<8x16xf32>
    %cst_21 = arith.constant 1.000000e+00 : f32
    %65 = vector.broadcast %cst_21 : f32 to vector<8x16xf32>
    %66 = arith.addf %65, %64 : vector<8x16xf32>
    %67 = arith.divf %65, %66 : vector<8x16xf32>
    %68 = vector.extract_strided_slice %48 {offsets = [0, 32], sizes = [8, 16], strides = [1, 1]} : vector<8x48xf32> to vector<8x16xf32>
    %69 = vector.extract_strided_slice %51 {offsets = [0, 32], sizes = [8, 16], strides = [1, 1]} : vector<8x48xf32> to vector<8x16xf32>
    %70 = arith.mulf %59, %69 : vector<8x16xf32>
    %71 = arith.addf %68, %70 : vector<8x16xf32>
    %72 = math.tanh %71 : vector<8x16xf32>
    %cst_22 = arith.constant 1.000000e+00 : f32
    %73 = vector.broadcast %cst_22 : f32 to vector<8x16xf32>
    %74 = arith.subf %73, %67 : vector<8x16xf32>
    %75 = arith.mulf %74, %72 : vector<8x16xf32>
    %76 = arith.mulf %67, %46 : vector<8x16xf32>
    %77 = arith.addf %75, %76 : vector<8x16xf32>
    %78 = arith.addf %47, %77 : vector<8x16xf32>
    %79 = vector.extract_strided_slice %16 {offsets = [16, 0], sizes = [8, 48], strides = [1, 1]} : vector<64x48xf32> to vector<8x48xf32>
    %cst_23 = arith.constant dense<0.000000e+00> : vector<8x48xf32>
    %80 = tpu.matmul %77, %8, %cst_23 {dimension_numbers = #tpu.dot_dimension_numbers<[1], [0], [0], [1], [0, 0, 1, 1], [], []>} : vector<8x16xf32>, vector<16x48xf32>, vector<8x48xf32> -> vector<8x48xf32>
    %81 = vector.broadcast %10 : vector<1x48xf32> to vector<8x48xf32>
    %82 = arith.addf %80, %81 : vector<8x48xf32>
    %83 = vector.extract_strided_slice %79 {offsets = [0, 0], sizes = [8, 16], strides = [1, 1]} : vector<8x48xf32> to vector<8x16xf32>
    %84 = vector.extract_strided_slice %82 {offsets = [0, 0], sizes = [8, 16], strides = [1, 1]} : vector<8x48xf32> to vector<8x16xf32>
    %85 = arith.addf %83, %84 : vector<8x16xf32>
    %86 = arith.negf %85 : vector<8x16xf32>
    %87 = math.exp %86 : vector<8x16xf32>
    %cst_24 = arith.constant 1.000000e+00 : f32
    %88 = vector.broadcast %cst_24 : f32 to vector<8x16xf32>
    %89 = arith.addf %88, %87 : vector<8x16xf32>
    %90 = arith.divf %88, %89 : vector<8x16xf32>
    %91 = vector.extract_strided_slice %79 {offsets = [0, 16], sizes = [8, 16], strides = [1, 1]} : vector<8x48xf32> to vector<8x16xf32>
    %92 = vector.extract_strided_slice %82 {offsets = [0, 16], sizes = [8, 16], strides = [1, 1]} : vector<8x48xf32> to vector<8x16xf32>
    %93 = arith.addf %91, %92 : vector<8x16xf32>
    %94 = arith.negf %93 : vector<8x16xf32>
    %95 = math.exp %94 : vector<8x16xf32>
    %cst_25 = arith.constant 1.000000e+00 : f32
    %96 = vector.broadcast %cst_25 : f32 to vector<8x16xf32>
    %97 = arith.addf %96, %95 : vector<8x16xf32>
    %98 = arith.divf %96, %97 : vector<8x16xf32>
    %99 = vector.extract_strided_slice %79 {offsets = [0, 32], sizes = [8, 16], strides = [1, 1]} : vector<8x48xf32> to vector<8x16xf32>
    %100 = vector.extract_strided_slice %82 {offsets = [0, 32], sizes = [8, 16], strides = [1, 1]} : vector<8x48xf32> to vector<8x16xf32>
    %101 = arith.mulf %90, %100 : vector<8x16xf32>
    %102 = arith.addf %99, %101 : vector<8x16xf32>
    %103 = math.tanh %102 : vector<8x16xf32>
    %cst_26 = arith.constant 1.000000e+00 : f32
    %104 = vector.broadcast %cst_26 : f32 to vector<8x16xf32>
    %105 = arith.subf %104, %98 : vector<8x16xf32>
    %106 = arith.mulf %105, %103 : vector<8x16xf32>
    %107 = arith.mulf %98, %77 : vector<8x16xf32>
    %108 = arith.addf %106, %107 : vector<8x16xf32>
    %109 = arith.addf %78, %108 : vector<8x16xf32>
    %110 = vector.extract_strided_slice %16 {offsets = [24, 0], sizes = [8, 48], strides = [1, 1]} : vector<64x48xf32> to vector<8x48xf32>
    %cst_27 = arith.constant dense<0.000000e+00> : vector<8x48xf32>
    %111 = tpu.matmul %108, %8, %cst_27 {dimension_numbers = #tpu.dot_dimension_numbers<[1], [0], [0], [1], [0, 0, 1, 1], [], []>} : vector<8x16xf32>, vector<16x48xf32>, vector<8x48xf32> -> vector<8x48xf32>
    %112 = vector.broadcast %10 : vector<1x48xf32> to vector<8x48xf32>
    %113 = arith.addf %111, %112 : vector<8x48xf32>
    %114 = vector.extract_strided_slice %110 {offsets = [0, 0], sizes = [8, 16], strides = [1, 1]} : vector<8x48xf32> to vector<8x16xf32>
    %115 = vector.extract_strided_slice %113 {offsets = [0, 0], sizes = [8, 16], strides = [1, 1]} : vector<8x48xf32> to vector<8x16xf32>
    %116 = arith.addf %114, %115 : vector<8x16xf32>
    %117 = arith.negf %116 : vector<8x16xf32>
    %118 = math.exp %117 : vector<8x16xf32>
    %cst_28 = arith.constant 1.000000e+00 : f32
    %119 = vector.broadcast %cst_28 : f32 to vector<8x16xf32>
    %120 = arith.addf %119, %118 : vector<8x16xf32>
    %121 = arith.divf %119, %120 : vector<8x16xf32>
    %122 = vector.extract_strided_slice %110 {offsets = [0, 16], sizes = [8, 16], strides = [1, 1]} : vector<8x48xf32> to vector<8x16xf32>
    %123 = vector.extract_strided_slice %113 {offsets = [0, 16], sizes = [8, 16], strides = [1, 1]} : vector<8x48xf32> to vector<8x16xf32>
    %124 = arith.addf %122, %123 : vector<8x16xf32>
    %125 = arith.negf %124 : vector<8x16xf32>
    %126 = math.exp %125 : vector<8x16xf32>
    %cst_29 = arith.constant 1.000000e+00 : f32
    %127 = vector.broadcast %cst_29 : f32 to vector<8x16xf32>
    %128 = arith.addf %127, %126 : vector<8x16xf32>
    %129 = arith.divf %127, %128 : vector<8x16xf32>
    %130 = vector.extract_strided_slice %110 {offsets = [0, 32], sizes = [8, 16], strides = [1, 1]} : vector<8x48xf32> to vector<8x16xf32>
    %131 = vector.extract_strided_slice %113 {offsets = [0, 32], sizes = [8, 16], strides = [1, 1]} : vector<8x48xf32> to vector<8x16xf32>
    %132 = arith.mulf %121, %131 : vector<8x16xf32>
    %133 = arith.addf %130, %132 : vector<8x16xf32>
    %134 = math.tanh %133 : vector<8x16xf32>
    %cst_30 = arith.constant 1.000000e+00 : f32
    %135 = vector.broadcast %cst_30 : f32 to vector<8x16xf32>
    %136 = arith.subf %135, %129 : vector<8x16xf32>
    %137 = arith.mulf %136, %134 : vector<8x16xf32>
    %138 = arith.mulf %129, %108 : vector<8x16xf32>
    %139 = arith.addf %137, %138 : vector<8x16xf32>
    %140 = arith.addf %109, %139 : vector<8x16xf32>
    %141 = vector.extract_strided_slice %16 {offsets = [32, 0], sizes = [8, 48], strides = [1, 1]} : vector<64x48xf32> to vector<8x48xf32>
    %cst_31 = arith.constant dense<0.000000e+00> : vector<8x48xf32>
    %142 = tpu.matmul %139, %8, %cst_31 {dimension_numbers = #tpu.dot_dimension_numbers<[1], [0], [0], [1], [0, 0, 1, 1], [], []>} : vector<8x16xf32>, vector<16x48xf32>, vector<8x48xf32> -> vector<8x48xf32>
    %143 = vector.broadcast %10 : vector<1x48xf32> to vector<8x48xf32>
    %144 = arith.addf %142, %143 : vector<8x48xf32>
    %145 = vector.extract_strided_slice %141 {offsets = [0, 0], sizes = [8, 16], strides = [1, 1]} : vector<8x48xf32> to vector<8x16xf32>
    %146 = vector.extract_strided_slice %144 {offsets = [0, 0], sizes = [8, 16], strides = [1, 1]} : vector<8x48xf32> to vector<8x16xf32>
    %147 = arith.addf %145, %146 : vector<8x16xf32>
    %148 = arith.negf %147 : vector<8x16xf32>
    %149 = math.exp %148 : vector<8x16xf32>
    %cst_32 = arith.constant 1.000000e+00 : f32
    %150 = vector.broadcast %cst_32 : f32 to vector<8x16xf32>
    %151 = arith.addf %150, %149 : vector<8x16xf32>
    %152 = arith.divf %150, %151 : vector<8x16xf32>
    %153 = vector.extract_strided_slice %141 {offsets = [0, 16], sizes = [8, 16], strides = [1, 1]} : vector<8x48xf32> to vector<8x16xf32>
    %154 = vector.extract_strided_slice %144 {offsets = [0, 16], sizes = [8, 16], strides = [1, 1]} : vector<8x48xf32> to vector<8x16xf32>
    %155 = arith.addf %153, %154 : vector<8x16xf32>
    %156 = arith.negf %155 : vector<8x16xf32>
    %157 = math.exp %156 : vector<8x16xf32>
    %cst_33 = arith.constant 1.000000e+00 : f32
    %158 = vector.broadcast %cst_33 : f32 to vector<8x16xf32>
    %159 = arith.addf %158, %157 : vector<8x16xf32>
    %160 = arith.divf %158, %159 : vector<8x16xf32>
    %161 = vector.extract_strided_slice %141 {offsets = [0, 32], sizes = [8, 16], strides = [1, 1]} : vector<8x48xf32> to vector<8x16xf32>
    %162 = vector.extract_strided_slice %144 {offsets = [0, 32], sizes = [8, 16], strides = [1, 1]} : vector<8x48xf32> to vector<8x16xf32>
    %163 = arith.mulf %152, %162 : vector<8x16xf32>
    %164 = arith.addf %161, %163 : vector<8x16xf32>
    %165 = math.tanh %164 : vector<8x16xf32>
    %cst_34 = arith.constant 1.000000e+00 : f32
    %166 = vector.broadcast %cst_34 : f32 to vector<8x16xf32>
    %167 = arith.subf %166, %160 : vector<8x16xf32>
    %168 = arith.mulf %167, %165 : vector<8x16xf32>
    %169 = arith.mulf %160, %139 : vector<8x16xf32>
    %170 = arith.addf %168, %169 : vector<8x16xf32>
    %171 = arith.addf %140, %170 : vector<8x16xf32>
    %172 = vector.extract_strided_slice %16 {offsets = [40, 0], sizes = [8, 48], strides = [1, 1]} : vector<64x48xf32> to vector<8x48xf32>
    %cst_35 = arith.constant dense<0.000000e+00> : vector<8x48xf32>
    %173 = tpu.matmul %170, %8, %cst_35 {dimension_numbers = #tpu.dot_dimension_numbers<[1], [0], [0], [1], [0, 0, 1, 1], [], []>} : vector<8x16xf32>, vector<16x48xf32>, vector<8x48xf32> -> vector<8x48xf32>
    %174 = vector.broadcast %10 : vector<1x48xf32> to vector<8x48xf32>
    %175 = arith.addf %173, %174 : vector<8x48xf32>
    %176 = vector.extract_strided_slice %172 {offsets = [0, 0], sizes = [8, 16], strides = [1, 1]} : vector<8x48xf32> to vector<8x16xf32>
    %177 = vector.extract_strided_slice %175 {offsets = [0, 0], sizes = [8, 16], strides = [1, 1]} : vector<8x48xf32> to vector<8x16xf32>
    %178 = arith.addf %176, %177 : vector<8x16xf32>
    %179 = arith.negf %178 : vector<8x16xf32>
    %180 = math.exp %179 : vector<8x16xf32>
    %cst_36 = arith.constant 1.000000e+00 : f32
    %181 = vector.broadcast %cst_36 : f32 to vector<8x16xf32>
    %182 = arith.addf %181, %180 : vector<8x16xf32>
    %183 = arith.divf %181, %182 : vector<8x16xf32>
    %184 = vector.extract_strided_slice %172 {offsets = [0, 16], sizes = [8, 16], strides = [1, 1]} : vector<8x48xf32> to vector<8x16xf32>
    %185 = vector.extract_strided_slice %175 {offsets = [0, 16], sizes = [8, 16], strides = [1, 1]} : vector<8x48xf32> to vector<8x16xf32>
    %186 = arith.addf %184, %185 : vector<8x16xf32>
    %187 = arith.negf %186 : vector<8x16xf32>
    %188 = math.exp %187 : vector<8x16xf32>
    %cst_37 = arith.constant 1.000000e+00 : f32
    %189 = vector.broadcast %cst_37 : f32 to vector<8x16xf32>
    %190 = arith.addf %189, %188 : vector<8x16xf32>
    %191 = arith.divf %189, %190 : vector<8x16xf32>
    %192 = vector.extract_strided_slice %172 {offsets = [0, 32], sizes = [8, 16], strides = [1, 1]} : vector<8x48xf32> to vector<8x16xf32>
    %193 = vector.extract_strided_slice %175 {offsets = [0, 32], sizes = [8, 16], strides = [1, 1]} : vector<8x48xf32> to vector<8x16xf32>
    %194 = arith.mulf %183, %193 : vector<8x16xf32>
    %195 = arith.addf %192, %194 : vector<8x16xf32>
    %196 = math.tanh %195 : vector<8x16xf32>
    %cst_38 = arith.constant 1.000000e+00 : f32
    %197 = vector.broadcast %cst_38 : f32 to vector<8x16xf32>
    %198 = arith.subf %197, %191 : vector<8x16xf32>
    %199 = arith.mulf %198, %196 : vector<8x16xf32>
    %200 = arith.mulf %191, %170 : vector<8x16xf32>
    %201 = arith.addf %199, %200 : vector<8x16xf32>
    %202 = arith.addf %171, %201 : vector<8x16xf32>
    %203 = vector.extract_strided_slice %16 {offsets = [48, 0], sizes = [8, 48], strides = [1, 1]} : vector<64x48xf32> to vector<8x48xf32>
    %cst_39 = arith.constant dense<0.000000e+00> : vector<8x48xf32>
    %204 = tpu.matmul %201, %8, %cst_39 {dimension_numbers = #tpu.dot_dimension_numbers<[1], [0], [0], [1], [0, 0, 1, 1], [], []>} : vector<8x16xf32>, vector<16x48xf32>, vector<8x48xf32> -> vector<8x48xf32>
    %205 = vector.broadcast %10 : vector<1x48xf32> to vector<8x48xf32>
    %206 = arith.addf %204, %205 : vector<8x48xf32>
    %207 = vector.extract_strided_slice %203 {offsets = [0, 0], sizes = [8, 16], strides = [1, 1]} : vector<8x48xf32> to vector<8x16xf32>
    %208 = vector.extract_strided_slice %206 {offsets = [0, 0], sizes = [8, 16], strides = [1, 1]} : vector<8x48xf32> to vector<8x16xf32>
    %209 = arith.addf %207, %208 : vector<8x16xf32>
    %210 = arith.negf %209 : vector<8x16xf32>
    %211 = math.exp %210 : vector<8x16xf32>
    %cst_40 = arith.constant 1.000000e+00 : f32
    %212 = vector.broadcast %cst_40 : f32 to vector<8x16xf32>
    %213 = arith.addf %212, %211 : vector<8x16xf32>
    %214 = arith.divf %212, %213 : vector<8x16xf32>
    %215 = vector.extract_strided_slice %203 {offsets = [0, 16], sizes = [8, 16], strides = [1, 1]} : vector<8x48xf32> to vector<8x16xf32>
    %216 = vector.extract_strided_slice %206 {offsets = [0, 16], sizes = [8, 16], strides = [1, 1]} : vector<8x48xf32> to vector<8x16xf32>
    %217 = arith.addf %215, %216 : vector<8x16xf32>
    %218 = arith.negf %217 : vector<8x16xf32>
    %219 = math.exp %218 : vector<8x16xf32>
    %cst_41 = arith.constant 1.000000e+00 : f32
    %220 = vector.broadcast %cst_41 : f32 to vector<8x16xf32>
    %221 = arith.addf %220, %219 : vector<8x16xf32>
    %222 = arith.divf %220, %221 : vector<8x16xf32>
    %223 = vector.extract_strided_slice %203 {offsets = [0, 32], sizes = [8, 16], strides = [1, 1]} : vector<8x48xf32> to vector<8x16xf32>
    %224 = vector.extract_strided_slice %206 {offsets = [0, 32], sizes = [8, 16], strides = [1, 1]} : vector<8x48xf32> to vector<8x16xf32>
    %225 = arith.mulf %214, %224 : vector<8x16xf32>
    %226 = arith.addf %223, %225 : vector<8x16xf32>
    %227 = math.tanh %226 : vector<8x16xf32>
    %cst_42 = arith.constant 1.000000e+00 : f32
    %228 = vector.broadcast %cst_42 : f32 to vector<8x16xf32>
    %229 = arith.subf %228, %222 : vector<8x16xf32>
    %230 = arith.mulf %229, %227 : vector<8x16xf32>
    %231 = arith.mulf %222, %201 : vector<8x16xf32>
    %232 = arith.addf %230, %231 : vector<8x16xf32>
    %233 = arith.addf %202, %232 : vector<8x16xf32>
    %234 = vector.extract_strided_slice %16 {offsets = [56, 0], sizes = [8, 48], strides = [1, 1]} : vector<64x48xf32> to vector<8x48xf32>
    %cst_43 = arith.constant dense<0.000000e+00> : vector<8x48xf32>
    %235 = tpu.matmul %232, %8, %cst_43 {dimension_numbers = #tpu.dot_dimension_numbers<[1], [0], [0], [1], [0, 0, 1, 1], [], []>} : vector<8x16xf32>, vector<16x48xf32>, vector<8x48xf32> -> vector<8x48xf32>
    %236 = vector.broadcast %10 : vector<1x48xf32> to vector<8x48xf32>
    %237 = arith.addf %235, %236 : vector<8x48xf32>
    %238 = vector.extract_strided_slice %234 {offsets = [0, 0], sizes = [8, 16], strides = [1, 1]} : vector<8x48xf32> to vector<8x16xf32>
    %239 = vector.extract_strided_slice %237 {offsets = [0, 0], sizes = [8, 16], strides = [1, 1]} : vector<8x48xf32> to vector<8x16xf32>
    %240 = arith.addf %238, %239 : vector<8x16xf32>
    %241 = arith.negf %240 : vector<8x16xf32>
    %242 = math.exp %241 : vector<8x16xf32>
    %cst_44 = arith.constant 1.000000e+00 : f32
    %243 = vector.broadcast %cst_44 : f32 to vector<8x16xf32>
    %244 = arith.addf %243, %242 : vector<8x16xf32>
    %245 = arith.divf %243, %244 : vector<8x16xf32>
    %246 = vector.extract_strided_slice %234 {offsets = [0, 16], sizes = [8, 16], strides = [1, 1]} : vector<8x48xf32> to vector<8x16xf32>
    %247 = vector.extract_strided_slice %237 {offsets = [0, 16], sizes = [8, 16], strides = [1, 1]} : vector<8x48xf32> to vector<8x16xf32>
    %248 = arith.addf %246, %247 : vector<8x16xf32>
    %249 = arith.negf %248 : vector<8x16xf32>
    %250 = math.exp %249 : vector<8x16xf32>
    %cst_45 = arith.constant 1.000000e+00 : f32
    %251 = vector.broadcast %cst_45 : f32 to vector<8x16xf32>
    %252 = arith.addf %251, %250 : vector<8x16xf32>
    %253 = arith.divf %251, %252 : vector<8x16xf32>
    %254 = vector.extract_strided_slice %234 {offsets = [0, 32], sizes = [8, 16], strides = [1, 1]} : vector<8x48xf32> to vector<8x16xf32>
    %255 = vector.extract_strided_slice %237 {offsets = [0, 32], sizes = [8, 16], strides = [1, 1]} : vector<8x48xf32> to vector<8x16xf32>
    %256 = arith.mulf %245, %255 : vector<8x16xf32>
    %257 = arith.addf %254, %256 : vector<8x16xf32>
    %258 = math.tanh %257 : vector<8x16xf32>
    %cst_46 = arith.constant 1.000000e+00 : f32
    %259 = vector.broadcast %cst_46 : f32 to vector<8x16xf32>
    %260 = arith.subf %259, %253 : vector<8x16xf32>
    %261 = arith.mulf %260, %258 : vector<8x16xf32>
    %262 = arith.mulf %253, %232 : vector<8x16xf32>
    %263 = arith.addf %261, %262 : vector<8x16xf32>
    %264 = arith.addf %233, %263 : vector<8x16xf32>
    %265 = arith.mulf %6, %264 : vector<8x16xf32>
    %266 = tpu.concatenate %265, %0, %1 in 1 : vector<8x16xf32>, vector<8x16xf32>, vector<8x16xf32> -> vector<8x48xf32>
    %c64 = arith.constant 64 : index
    %c0_47 = arith.constant 0 : index
    %267 = vector.load %arg3[%c64, %c0_47] : memref<160x128xf32, #tpu.memory_space<vmem>>, vector<1x48xf32>
    %c65 = arith.constant 65 : index
    %c0_48 = arith.constant 0 : index
    %268 = vector.load %arg3[%c65, %c0_48] : memref<160x128xf32, #tpu.memory_space<vmem>>, vector<1x48xf32>
    %cst_49 = arith.constant dense<0.000000e+00> : vector<48xf32>
    %269 = vector.multi_reduction <add>, %266, %cst_49 [0] : vector<8x48xf32> to vector<48xf32>
    %270 = vector.shape_cast %269 : vector<48xf32> to vector<1x48xf32>
    %cst_50 = arith.constant 8.000000e+00 : f32
    %271 = vector.broadcast %cst_50 : f32 to vector<1x48xf32>
    %272 = arith.divf %270, %271 : vector<1x48xf32>
    %273 = vector.broadcast %272 : vector<1x48xf32> to vector<8x48xf32>
    %274 = arith.subf %266, %273 : vector<8x48xf32>
    %275 = arith.mulf %274, %274 : vector<8x48xf32>
    %cst_51 = arith.constant dense<0.000000e+00> : vector<48xf32>
    %276 = vector.multi_reduction <add>, %275, %cst_51 [0] : vector<8x48xf32> to vector<48xf32>
    %277 = vector.shape_cast %276 : vector<48xf32> to vector<1x48xf32>
    %cst_52 = arith.constant 8.000000e+00 : f32
    %278 = vector.broadcast %cst_52 : f32 to vector<1x48xf32>
    %279 = arith.divf %277, %278 : vector<1x48xf32>
    %280 = vector.broadcast %272 : vector<1x48xf32> to vector<8x48xf32>
    %281 = arith.subf %266, %280 : vector<8x48xf32>
    %cst_53 = arith.constant 9.99999974E-6 : f32
    %282 = vector.broadcast %cst_53 : f32 to vector<1x48xf32>
    %283 = arith.addf %279, %282 : vector<1x48xf32>
    %284 = math.rsqrt %283 : vector<1x48xf32>
    %285 = vector.broadcast %284 : vector<1x48xf32> to vector<8x48xf32>
    %286 = arith.mulf %281, %285 : vector<8x48xf32>
    %287 = vector.broadcast %267 : vector<1x48xf32> to vector<8x48xf32>
    %288 = arith.mulf %286, %287 : vector<8x48xf32>
    %289 = vector.broadcast %268 : vector<1x48xf32> to vector<8x48xf32>
    %290 = arith.addf %288, %289 : vector<8x48xf32>
    %c72 = arith.constant 72 : index
    %c0_54 = arith.constant 0 : index
    %291 = vector.load %arg3[%c72, %c0_54] : memref<160x128xf32, #tpu.memory_space<vmem>>, vector<48x16xf32>
    %c120 = arith.constant 120 : index
    %c0_55 = arith.constant 0 : index
    %292 = vector.load %arg3[%c120, %c0_55] : memref<160x128xf32, #tpu.memory_space<vmem>>, vector<1x16xf32>
    %cst_56 = arith.constant dense<0.000000e+00> : vector<8x16xf32>
    %293 = tpu.matmul %290, %291, %cst_56 {dimension_numbers = #tpu.dot_dimension_numbers<[1], [0], [0], [1], [0, 0, 1, 1], [], []>} : vector<8x48xf32>, vector<48x16xf32>, vector<8x16xf32> -> vector<8x16xf32>
    %294 = vector.broadcast %292 : vector<1x16xf32> to vector<8x16xf32>
    %295 = arith.addf %293, %294 : vector<8x16xf32>
    %cst_57 = arith.constant 0.000000e+00 : f32
    %296 = vector.broadcast %cst_57 : f32 to vector<8x16xf32>
    %297 = arith.maximumf %295, %296 : vector<8x16xf32>
    %c128 = arith.constant 128 : index
    %c0_58 = arith.constant 0 : index
    %298 = vector.load %arg3[%c128, %c0_58] : memref<160x128xf32, #tpu.memory_space<vmem>>, vector<1x16xf32>
    %c129 = arith.constant 129 : index
    %c0_59 = arith.constant 0 : index
    %299 = vector.load %arg3[%c129, %c0_59] : memref<160x128xf32, #tpu.memory_space<vmem>>, vector<1x16xf32>
    %cst_60 = arith.constant dense<0.000000e+00> : vector<16xf32>
    %300 = vector.multi_reduction <add>, %297, %cst_60 [0] : vector<8x16xf32> to vector<16xf32>
    %301 = vector.shape_cast %300 : vector<16xf32> to vector<1x16xf32>
    %cst_61 = arith.constant 8.000000e+00 : f32
    %302 = vector.broadcast %cst_61 : f32 to vector<1x16xf32>
    %303 = arith.divf %301, %302 : vector<1x16xf32>
    %304 = vector.broadcast %303 : vector<1x16xf32> to vector<8x16xf32>
    %305 = arith.subf %297, %304 : vector<8x16xf32>
    %306 = arith.mulf %305, %305 : vector<8x16xf32>
    %cst_62 = arith.constant dense<0.000000e+00> : vector<16xf32>
    %307 = vector.multi_reduction <add>, %306, %cst_62 [0] : vector<8x16xf32> to vector<16xf32>
    %308 = vector.shape_cast %307 : vector<16xf32> to vector<1x16xf32>
    %cst_63 = arith.constant 8.000000e+00 : f32
    %309 = vector.broadcast %cst_63 : f32 to vector<1x16xf32>
    %310 = arith.divf %308, %309 : vector<1x16xf32>
    %311 = vector.broadcast %303 : vector<1x16xf32> to vector<8x16xf32>
    %312 = arith.subf %297, %311 : vector<8x16xf32>
    %cst_64 = arith.constant 9.99999974E-6 : f32
    %313 = vector.broadcast %cst_64 : f32 to vector<1x16xf32>
    %314 = arith.addf %310, %313 : vector<1x16xf32>
    %315 = math.rsqrt %314 : vector<1x16xf32>
    %316 = vector.broadcast %315 : vector<1x16xf32> to vector<8x16xf32>
    %317 = arith.mulf %312, %316 : vector<8x16xf32>
    %318 = vector.broadcast %298 : vector<1x16xf32> to vector<8x16xf32>
    %319 = arith.mulf %317, %318 : vector<8x16xf32>
    %320 = vector.broadcast %299 : vector<1x16xf32> to vector<8x16xf32>
    %321 = arith.addf %319, %320 : vector<8x16xf32>
    %c136 = arith.constant 136 : index
    %c0_65 = arith.constant 0 : index
    %322 = vector.load %arg3[%c136, %c0_65] : memref<160x128xf32, #tpu.memory_space<vmem>>, vector<16x128xf32>
    %c152 = arith.constant 152 : index
    %c0_66 = arith.constant 0 : index
    %323 = vector.load %arg3[%c152, %c0_66] : memref<160x128xf32, #tpu.memory_space<vmem>>, vector<1x128xf32>
    %cst_67 = arith.constant dense<0.000000e+00> : vector<8x128xf32>
    %324 = tpu.matmul %321, %322, %cst_67 {dimension_numbers = #tpu.dot_dimension_numbers<[1], [0], [0], [1], [0, 0, 1, 1], [], []>} : vector<8x16xf32>, vector<16x128xf32>, vector<8x128xf32> -> vector<8x128xf32>
    %325 = vector.broadcast %323 : vector<1x128xf32> to vector<8x128xf32>
    %326 = arith.addf %324, %325 : vector<8x128xf32>
    %cst_68 = arith.constant dense<0xFF800000> : vector<8xf32>
    %327 = vector.multi_reduction <maximumf>, %326, %cst_68 [1] : vector<8x128xf32> to vector<8xf32>
    %328 = vector.shape_cast %327 : vector<8xf32> to vector<8x1xf32>
    %329 = vector.broadcast %328 : vector<8x1xf32> to vector<8x128xf32>
    %330 = arith.subf %326, %329 : vector<8x128xf32>
    %331 = math.exp %330 : vector<8x128xf32>
    %cst_69 = arith.constant dense<0.000000e+00> : vector<8xf32>
    %332 = vector.multi_reduction <add>, %331, %cst_69 [1] : vector<8x128xf32> to vector<8xf32>
    %333 = vector.shape_cast %332 : vector<8xf32> to vector<8x1xf32>
    %334 = vector.broadcast %333 : vector<8x1xf32> to vector<8x128xf32>
    %335 = arith.divf %331, %334 : vector<8x128xf32>
    %c0_70 = arith.constant 0 : index
    %c0_71 = arith.constant 0 : index
    %336 = vector.load %arg4[%c0_70, %c0_71] : memref<8x128xf32, #tpu.memory_space<vmem>>, vector<8x128xf32>
    tpu.vector_store %arg4[%c0_70, %c0_71], %335 {strides = array<i32>} : memref<8x128xf32, #tpu.memory_space<vmem>>, vector<8x128xf32>,
    return
  }
}

</mosaic_0001>

<bundles_post_ra>
// kernel: tpu_custom_call.1
= control target key start
LH: loop header
LB: loop body
LE: loop exit
PB: predicated region body
PF: predicated region fallthrough
CT: control target
= control target key end

     0   :  { %9 = vsyncpa [#allocation4], 0  ;;  %s1944_s0 = inlined_call_operand.vmem [shape: f32[8,16], index: 0, kind: input, shape index: {}]   ;;  %s1945_s1 = inlined_call_operand.vmem [shape: f32[64,16], index: 1, kind: input, shape index: {}]   ;;  %s1946_s2 = inlined_call_operand.vmem [shape: f32[8,16], index: 2, kind: input, shape index: {}]   ;;  %s1947_s3 = inlined_call_operand.hbm [shape: f32[160,128], index: 3, kind: input, shape index: {}]   ;;  %s1948_s4 = inlined_call_operand.hbm [shape: f32[8,128], index: 4, kind: output, shape index: {}]  }
   0x1   :  { %10 = vsyncpa [#allocation5], 0  ;;  %s1694_s15 = smov [#allocation3]   ;;  %s1646_s19 = scalar_lea.hbm %s1947_s3, 2560 }
   0x2   :  { %s22_s16 = sshll.u32 %s1694_s15, 4  ;;  %p1647_p0 = scmp.ne.s32.totalorder %s1947_s3, %s1646_s19  ;;  %s23_s16 = int_to_ptr.vmem [resolvable:$true] %s22_s16 }
   0x3   :  { %p1650_p1 = scmp.lt.u32.totalorder %s1646_s19, %s1947_s3 }
   0x5   :  { %p1652_p2 = pnand %p1650_p1, %p1647_p0 }
   0x7   :  { %1655 = shalt.err (!%p1652_p2)
}
   0x8   :  { %s1656_s24 = scalar_lea.vmem %s23_s16, 2560  ;;  %p1661_p4 = scmp.lt.s32.totalorder %s23_s16, %s23_s16 }
   0x9   :  { %p1657_p3 = scmp.ne.s32.totalorder %s23_s16, %s1656_s24  ;;  %p1662_p5 = scmp.lt.s32.totalorder %s1656_s24, %s1656_s24 }
   0xb   :  { %p1663_p6 = por %p1662_p5, %p1661_p4 }
   0xd   :  { %p1664_p7 = pnand %p1663_p6, %p1657_p3 }
   0xf   :  { %1667 = shalt.err (!%p1664_p7)
}
  0x10   :  { %s1695_s25 = smov 128   ;;  %s1696_s26 = smov 8  }
  0x11   :  { %28 = dma.hbm_to_vmem [thread:$0]  %s1947_s3, 2560, %s23_s16, [#allocation4], %s1695_s25, %s1695_s25, %s1696_s26  }
  0x12   :  { %1690 = dma.done.wait [#allocation4], 2560  }
  0x13   :  { %1691 = vsyncadd [#allocation4], 4294964736  ;;  %v1697_v0 = vmov 0.0|0.0   ;;  %vm1698_vm0 = vmmov 0   ;;  %v1699_v1 = vmov 0.0   ;;  %v34_v2 = vld [vmem:[#allocation3 + $0x28] sm:$0xff] }
  0x14   :  { %1536 = vmatprep.subr.bf16.mxu0 %v1697_v0  ;;  %1439 = vmatprep.mubr.msk.f32.mxu0 %vm1698_vm0, %v1699_v1  ;;  %v35_v3 = vld [vmem:[#allocation3 + $0x30] sm:$0xff]  ;;  %v115_v5 = vld [vmem:[#allocation3] sm:$0xff]  ;;  %v116_v6 = vld [vmem:[#allocation3 + $0x8] sm:$0xff]  ;;  %vm41_vm1 = vcmask 130048   ;;  %s1701_s8 = smov 32   ;;  %s1702_s9 = smov 112  }
  0x15   :  { %v1537_v4 = vpack.c.bf16 %v35_v3, %v34_v2  ;;  %v117_v7 = vld [vmem:[#allocation3 + $0x10] sm:$0xff]  ;;  %v1539_v8 = vpack.c.bf16 %v116_v6, %v115_v5  ;;  %v118_v9 = vld [vmem:[#allocation3 + $0x18] sm:$0xff]  ;;  %v121_v10 = vld [vmem:[%s1945_s1] sm:$0xff]  ;;  %vm1093_vm2 = vcmask 261120   ;;  %vm1097_vm3 = vcmask 392192  }
  0x16   :  { %v1751_v11 = vld [vmem:[%s1946_s2] sm:$0xff]  ;;  %v1753_v12 = vpack.c.bf16 %v118_v9, %v117_v7  ;;  %1446 = vmatprep.mubr.msk.f32.mxu1 %vm41_vm1, %v121_v10  ;;  %v122_v13 = vld [vmem:[%s1945_s1 + $0x8] sm:$0xff]  ;;  %s1700_s2 = smov 96   ;;  %v123_v53 = vld [vmem:[%s1945_s1 + $0x10] sm:$0xff] }
  0x17   :  { %1538 = vmatpush3.bf16.msra.mxu0 %v1537_v4  ;;  %1540 = vmatprep.subr.bf16.mxu1 %v1539_v8  ;;  %v1777_v17 = vld [vmem:[#allocation3 + $0x21] ss:$0 sm:$0xff]  ;;  %v1781_v22 = vld [vmem:[#allocation3 + $0x20] ss:$0 sm:$0xff]  ;;  %v124_v54 = vld [vmem:[%s1945_s1 + $0x18] sm:$0xff] }
  0x18   :  { %1543 = vmatprep.subr.bf16.mxu0 %v1697_v0  ;;  %1542 = vmatpush3.bf16.msra.mxu1 %v1539_v8 }
  0x19   :  { %1555 = vmatprep.subr.bf16.mxu1 %v1697_v0 }
  0x1a   :  { %1440 = vmatmul.mubr.msk.f32.vlgmr.msra.gmra.mrb[0].mxu0 %vm41_vm1, %v1751_v11 }
  0x1b   :  { %1545 = vmatpush3.bf16.msra.mxu0 %v1753_v12  ;;  %1462 = vmatprep.mubr.msk.f32.mxu0 %vm1698_vm0, %v1699_v1 }
  0x1c   :  { %1447 = vmatmul.mubr.msk.f32.vlgmr.msra.gmra.mrb[0].mxu1 %vm41_vm1, %v122_v13  ;;  %1546 = vmatprep.subr.bf16.mxu0 %v1697_v0 }
  0x1d   :  { %1557 = vmatpush3.bf16.msra.mxu1 %v1753_v12  ;;  %1449 = vmatprep.mubr.msk.f32.mxu1 %vm41_vm1, %v123_v53 }
  0x1e   :  { %1463 = vmatmul.mubr.f32.vlgmr.msra.gmra.mrb[2].mxu0 %v1699_v1  ;;  %1561 = vmatprep.subr.bf16.mxu1 %v1697_v0 }
  0x1f   :  { %1548 = vmatpush3.bf16.msra.mxu0 %v1753_v12  ;;  %1469 = vmatprep.mubr.msk.f32.mxu0 %vm1698_vm0, %v1699_v1 }
  0x20   :  { %1549 = vmatprep.subr.bf16.mxu0 %v1697_v0  ;;  %1450 = vmatmul.mubr.msk.f32.gmra.mrb[2].mxu1 %vm41_vm1, %v124_v54 }
  0xed   :  { %v1775_v14 = vpop.f32.mrb[0].mxu0 }
  0xee   :  { %v1441_v15 = vpop.f32.mrb[1].mxu0 }
  0xef   :  { %v1448_v16 = vpop.f32.mrb[0].mxu1 }
  0xf0   :  { %v223_v18 = vpop.f32.mrb[1].mxu1  ;;  %v229_v43 = vadd.f32 %v1448_v16, %v1781_v22 }
  0xf1   :  { %v335_v19 = vpop.f32.mrb[2].mxu0  ;;  %v224_v23 = vadd.f32 %v1781_v22, %v223_v18 }
  0xf2   :  { %v336_v20 = vadd.f32 %v1777_v17, %v335_v19  ;;  %v1464_v21 = vpop.f32.mrb[3].mxu0 }
  0xf3   :  { %v1451_v61 = vpop.f32.mrb[2].mxu1 }
  0xf4   :  { %347 = vrot.lane.b32.xlu0 %v336_v20, %s1700_s2  ;;  %v339_v24 = vadd.f32 %v336_v20, %v224_v23  ;;  %v233_v62 = vpop.f32.mrb[3].mxu1 }
  0xf5   :  { %v234_v5 = vadd.f32 %v1781_v22, %v233_v62 }
  0xf6   :  { %v1365_v25 = vmul.f32 -1.442695, %v339_v24 }
  0xf8   :  { %1590 = vpow2.f32 %v1365_v25 }
 0x102   :  { %v1591_v26 = vpop.eup %1590 }
 0x103   :  { %v343_v27 = vadd.f32 1.0, %v1591_v26 }
 0x105   :  { %1592 = vrcp.f32 %v343_v27 }
 0x10f   :  { %v1593_v28 = vpop.eup %1592 }
 0x110   :  { %v357_v34 = vsub.f32 1.0, %v1593_v28  ;;  %v363_v36 = vmul.f32 0.0, %v1593_v28 }
 0x166   :  { %v348_v29 = vpop.permute.xlu0 %347 }
 0x167   :  { %v350_v30 = vmul.f32 %v1593_v28, %v348_v29 }
 0x169   :  { %352 = vrot.lane.b32.xlu0 %v350_v30, %s1701_s8  ;;  %v239_v30 = vadd.f32 %v1451_v61, %v1781_v22 }
 0x1db   :  { %v353_v31 = vpop.permute.xlu0 %352 }
 0x1dc   :  { %v355_v32 = vadd.f32 %v353_v31, %v224_v23 }
 0x1de   :  { %1594 = vtanh.f32 %v355_v32 }
 0x1e8   :  { %v1595_v33 = vpop.eup %1594 }
 0x1e9   :  { %359 = vrot.lane.b32.xlu1 %v1595_v33, %s1702_s9 }
 0x25b   :  { %v360_v35 = vpop.permute.xlu1 %359 }
 0x25c   :  { %v362_v37 = vmul.f32 %v360_v35, %v357_v34 }
 0x25e   :  { %v1786_v38 = vadd.f32 %v363_v36, %v362_v37 }
 0x260   :  { %367 = vrot.lane.b32.xlu1 %v1786_v38, %s1702_s9 }
 0x2d2   :  { %v368_v39 = vpop.permute.xlu1 %367 }
 0x2d3   :  { %1470 = vmatmul.mubr.msk.f32.vlgmr.msra.gmra.mrb[4].mxu0 %vm41_vm1, %v368_v39 }
 0x2d4   :  { %1551 = vmatpush3.bf16.msra.mxu0 %v1753_v12  ;;  %1476 = vmatprep.mubr.msk.f32.mxu0 %vm1698_vm0, %v1699_v1 }
 0x2d5   :  { %1552 = vmatprep.subr.bf16.mxu0 %v1697_v0 }
 0x3a6   :  { %v437_v40 = vpop.f32.mrb[4].mxu0 }
 0x3a7   :  { %v438_v41 = vadd.f32 %v1777_v17, %v437_v40  ;;  %v1471_v42 = vpop.f32.mrb[5].mxu0 }
 0x3a8   :  { %v126_v42 = vld [vmem:[%s1945_s1 + $0x28] sm:$0xff] }
 0x3a9   :  { %449 = vrot.lane.b32.xlu0 %v438_v41, %s1700_s2  ;;  %v441_v44 = vadd.f32 %v438_v41, %v229_v43  ;;  %v125_v41 = vld [vmem:[%s1945_s1 + $0x20] sm:$0xff] }
 0x3aa   :  { %1452 = vmatprep.mubr.msk.f32.mxu1 %vm41_vm1, %v125_v41 }
 0x3ab   :  { %v1367_v45 = vmul.f32 -1.442695, %v441_v44  ;;  %1453 = vmatmul.mubr.msk.f32.gmra.mrb[4].mxu1 %vm41_vm1, %v126_v42  ;;  %v128_v44 = vld [vmem:[%s1945_s1 + $0x38] sm:$0xff] }
 0x3ad   :  { %1596 = vpow2.f32 %v1367_v45 }
 0x3b7   :  { %v1597_v46 = vpop.eup %1596 }
 0x3b8   :  { %v445_v47 = vadd.f32 1.0, %v1597_v46 }
 0x3ba   :  { %1598 = vrcp.f32 %v445_v47 }
 0x3c4   :  { %v1599_v48 = vpop.eup %1598 }
 0x3c5   :  { %v459_v56 = vsub.f32 1.0, %v1599_v48  ;;  %v465_v58 = vmul.f32 %v1599_v48, %v1786_v38 }
 0x41b   :  { %v450_v49 = vpop.permute.xlu0 %449 }
 0x41c   :  { %v452_v50 = vmul.f32 %v1599_v48, %v450_v49 }
 0x41e   :  { %454 = vrot.lane.b32.xlu1 %v452_v50, %s1701_s8 }
 0x490   :  { %v455_v51 = vpop.permute.xlu1 %454 }
 0x491   :  { %v457_v52 = vadd.f32 %v455_v51, %v229_v43  ;;  %v127_v43 = vld [vmem:[%s1945_s1 + $0x30] sm:$0xff]  ;;  %v1454_v51 = vpop.f32.mrb[4].mxu1  ;;  %s1703_s1 = smov 16  }
 0x492   :  { %1455 = vmatprep.mubr.msk.f32.mxu1 %vm41_vm1, %v127_v43 }
 0x493   :  { %1600 = vtanh.f32 %v457_v52  ;;  %1456 = vmatmul.mubr.msk.f32.gmra.mrb[6].mxu1 %vm41_vm1, %v128_v44  ;;  %v243_v52 = vpop.f32.mrb[5].mxu1 }
 0x494   :  { %1490 = vmatprep.mubr.msk.f32.mxu1 %vm1698_vm0, %v1699_v1 }
 0x49d   :  { %v1601_v55 = vpop.eup %1600 }
 0x49e   :  { %461 = vrot.lane.b32.xlu0 %v1601_v55, %s1702_s9 }
 0x510   :  { %v462_v57 = vpop.permute.xlu0 %461 }
 0x511   :  { %v464_v59 = vmul.f32 %v462_v57, %v459_v56 }
 0x513   :  { %v1809_v60 = vadd.f32 %v465_v58, %v464_v59  ;;  %v244_v59 = vadd.f32 %v1781_v22, %v243_v52 }
 0x515   :  { %469 = vrot.lane.b32.xlu1 %v1809_v60, %s1702_s9 }
 0x566   :  { %v1861_v53 = vpop.f32.mrb[6].mxu1 }
 0x567   :  { %v1863_v54 = vpop.f32.mrb[7].mxu1 }
 0x568   :  { %v254_v44 = vadd.f32 %v1781_v22, %v1863_v54 }
 0x587   :  { %v470_v63 = vpop.permute.xlu1 %469 }
 0x588   :  { %1477 = vmatmul.mubr.msk.f32.vlgmr.msra.gmra.mrb[6].mxu0 %vm41_vm1, %v470_v63 }
 0x589   :  { %1554 = vmatpush3.bf16.msra.mxu0 %v1753_v12  ;;  %1483 = vmatprep.mubr.msk.f32.mxu0 %vm1698_vm0, %v1699_v1 }
 0x58a   :  { %1558 = vmatprep.subr.bf16.mxu0 %v1697_v0 }
 0x65b   :  { %v539_v2 = vpop.f32.mrb[6].mxu0 }
 0x65c   :  { %v540_v3 = vadd.f32 %v1777_v17, %v539_v2  ;;  %v1478_v4 = vpop.f32.mrb[7].mxu0 }
 0x65e   :  { %551 = vrot.lane.b32.xlu0 %v540_v3, %s1700_s2  ;;  %v543_v6 = vadd.f32 %v540_v3, %v234_v5 }
 0x660   :  { %v1369_v7 = vmul.f32 -1.442695, %v543_v6 }
 0x662   :  { %1602 = vpow2.f32 %v1369_v7 }
 0x66c   :  { %v1603_v8 = vpop.eup %1602 }
 0x66d   :  { %v547_v9 = vadd.f32 1.0, %v1603_v8 }
 0x66f   :  { %1604 = vrcp.f32 %v547_v9 }
 0x679   :  { %v1605_v10 = vpop.eup %1604 }
 0x67a   :  { %v561_v20 = vsub.f32 1.0, %v1605_v10  ;;  %v567_v23 = vmul.f32 %v1605_v10, %v1809_v60 }
 0x6d0   :  { %v552_v13 = vpop.permute.xlu0 %551 }
 0x6d1   :  { %v554_v15 = vmul.f32 %v1605_v10, %v552_v13 }
 0x6d3   :  { %556 = vrot.lane.b32.xlu1 %v554_v15, %s1701_s8 }
 0x745   :  { %v557_v16 = vpop.permute.xlu1 %556 }
 0x746   :  { %v559_v18 = vadd.f32 %v557_v16, %v234_v5 }
 0x748   :  { %1606 = vtanh.f32 %v559_v18 }
 0x752   :  { %v1607_v19 = vpop.eup %1606 }
 0x753   :  { %563 = vrot.lane.b32.xlu0 %v1607_v19, %s1702_s9 }
 0x7c5   :  { %v564_v21 = vpop.permute.xlu0 %563 }
 0x7c6   :  { %v566_v24 = vmul.f32 %v564_v21, %v561_v20 }
 0x7c8   :  { %v1824_v25 = vadd.f32 %v567_v23, %v566_v24  ;;  %v249_v23 = vadd.f32 %v1454_v51, %v1781_v22 }
 0x7ca   :  { %571 = vrot.lane.b32.xlu1 %v1824_v25, %s1702_s9 }
 0x83c   :  { %v572_v26 = vpop.permute.xlu1 %571 }
 0x83d   :  { %1484 = vmatmul.mubr.msk.f32.vlgmr.msra.gmra.mrb[8].mxu0 %vm41_vm1, %v572_v26 }
 0x83e   :  { %1560 = vmatpush3.bf16.msra.mxu0 %v1753_v12  ;;  %1497 = vmatprep.mubr.msk.f32.mxu0 %vm1698_vm0, %v1699_v1 }
 0x83f   :  { %1564 = vmatprep.subr.bf16.mxu0 %v1697_v0 }
 0x910   :  { %v641_v27 = vpop.f32.mrb[8].mxu0 }
 0x911   :  { %v642_v28 = vadd.f32 %v1777_v17, %v641_v27  ;;  %v1485_v29 = vpop.f32.mrb[9].mxu0 }
 0x913   :  { %653 = vrot.lane.b32.xlu0 %v642_v28, %s1700_s2  ;;  %v645_v31 = vadd.f32 %v642_v28, %v239_v30 }
 0x915   :  { %v1371_v32 = vmul.f32 -1.442695, %v645_v31 }
 0x917   :  { %1608 = vpow2.f32 %v1371_v32 }
 0x921   :  { %v1609_v33 = vpop.eup %1608 }
 0x922   :  { %v649_v34 = vadd.f32 1.0, %v1609_v33 }
 0x924   :  { %1610 = vrcp.f32 %v649_v34 }
 0x92e   :  { %v1611_v35 = vpop.eup %1610 }
 0x92f   :  { %v663_v46 = vsub.f32 1.0, %v1611_v35  ;;  %v669_v48 = vmul.f32 %v1611_v35, %v1824_v25 }
 0x985   :  { %v654_v36 = vpop.permute.xlu0 %653 }
 0x986   :  { %v656_v37 = vmul.f32 %v1611_v35, %v654_v36 }
 0x988   :  { %658 = vrot.lane.b32.xlu1 %v656_v37, %s1701_s8 }
 0x9fa   :  { %v659_v39 = vpop.permute.xlu1 %658 }
 0x9fb   :  { %v661_v40 = vadd.f32 %v659_v39, %v239_v30 }
 0x9fd   :  { %1612 = vtanh.f32 %v661_v40 }
 0xa07   :  { %v1613_v45 = vpop.eup %1612 }
 0xa08   :  { %665 = vrot.lane.b32.xlu0 %v1613_v45, %s1702_s9 }
 0xa7a   :  { %v666_v47 = vpop.permute.xlu0 %665 }
 0xa7b   :  { %v668_v49 = vmul.f32 %v666_v47, %v663_v46 }
 0xa7d   :  { %v1857_v50 = vadd.f32 %v669_v48, %v668_v49 }
 0xa7f   :  { %673 = vrot.lane.b32.xlu1 %v1857_v50, %s1702_s9 }
 0xaf1   :  { %v674_v55 = vpop.permute.xlu1 %673 }
 0xaf2   :  { %1491 = vmatmul.mubr.msk.f32.vlgmr.msra.gmra.mrb[8].mxu1 %vm41_vm1, %v674_v55 }
 0xaf3   :  { %1563 = vmatpush3.bf16.msra.mxu1 %v1753_v12  ;;  %1504 = vmatprep.mubr.msk.f32.mxu1 %vm1698_vm0, %v1699_v1 }
 0xaf4   :  { %1567 = vmatprep.subr.bf16.mxu1 %v1697_v0 }
 0xbc5   :  { %v743_v56 = vpop.f32.mrb[8].mxu1 }
 0xbc6   :  { %v744_v57 = vadd.f32 %v1777_v17, %v743_v56  ;;  %v1492_v58 = vpop.f32.mrb[9].mxu1 }
 0xbc8   :  { %755 = vrot.lane.b32.xlu0 %v744_v57, %s1700_s2  ;;  %v747_v61 = vadd.f32 %v744_v57, %v244_v59 }
 0xbca   :  { %v1373_v62 = vmul.f32 -1.442695, %v747_v61 }
 0xbcc   :  { %1614 = vpow2.f32 %v1373_v62 }
 0xbd6   :  { %v1615_v63 = vpop.eup %1614 }
 0xbd7   :  { %v751_v2 = vadd.f32 1.0, %v1615_v63 }
 0xbd9   :  { %1616 = vrcp.f32 %v751_v2 }
 0xbe3   :  { %v1617_v3 = vpop.eup %1616 }
 0xbe4   :  { %v765_v9 = vsub.f32 1.0, %v1617_v3  ;;  %v771_v13 = vmul.f32 %v1617_v3, %v1857_v50 }
 0xc3a   :  { %v756_v4 = vpop.permute.xlu0 %755 }
 0xc3b   :  { %v758_v5 = vmul.f32 %v1617_v3, %v756_v4 }
 0xc3d   :  { %760 = vrot.lane.b32.xlu1 %v758_v5, %s1701_s8  ;;  %v259_v5 = vadd.f32 %v1861_v53, %v1781_v22  ;;  %v467_v22 = vadd.f32 %v1809_v60, %v1786_v38  ;;  %v1130_v38 = vld [vmem:[#allocation3 + $0x48] sm:$0xff]  ;;  %v1131_v60 = vld [vmem:[#allocation3 + $0x50] sm:$0xff] }
 0xc3f   :  { %v569_v53 = vadd.f32 %v1824_v25, %v467_v22  ;;  %v1568_v25 = vpack.c.bf16 %v1131_v60, %v1130_v38 }
 0xcaf   :  { %v761_v6 = vpop.permute.xlu1 %760 }
 0xcb0   :  { %v763_v7 = vadd.f32 %v761_v6, %v244_v59 }
 0xcb2   :  { %1618 = vtanh.f32 %v763_v7 }
 0xcbc   :  { %v1619_v8 = vpop.eup %1618 }
 0xcbd   :  { %767 = vrot.lane.b32.xlu0 %v1619_v8, %s1702_s9 }
 0xd2f   :  { %v768_v10 = vpop.permute.xlu0 %767 }
 0xd30   :  { %v770_v15 = vmul.f32 %v768_v10, %v765_v9 }
 0xd32   :  { %v1876_v16 = vadd.f32 %v771_v13, %v770_v15 }
 0xd34   :  { %775 = vrot.lane.b32.xlu1 %v1876_v16, %s1702_s9 }
 0xda6   :  { %v776_v18 = vpop.permute.xlu1 %775 }
 0xda7   :  { %1498 = vmatmul.mubr.msk.f32.vlgmr.msra.gmra.mrb[10].mxu0 %vm41_vm1, %v776_v18 }
 0xda8   :  { %1566 = vmatpush3.bf16.msra.mxu0 %v1753_v12  ;;  %1511 = vmatprep.mubr.msk.f32.mxu0 %vm1698_vm0, %v1699_v1 }
 0xda9   :  { %1576 = vmatprep.subr.bf16.mxu0 %v1697_v0 }
 0xe7a   :  { %v845_v19 = vpop.f32.mrb[10].mxu0 }
 0xe7b   :  { %v846_v20 = vadd.f32 %v1777_v17, %v845_v19  ;;  %v1499_v21 = vpop.f32.mrb[11].mxu0  ;;  %v671_v19 = vadd.f32 %v1857_v50, %v569_v53  ;;  %v1132_v50 = vld [vmem:[#allocation3 + $0x58] sm:$0xff] }
 0xe7d   :  { %857 = vrot.lane.b32.xlu0 %v846_v20, %s1700_s2  ;;  %v849_v24 = vadd.f32 %v846_v20, %v249_v23  ;;  %v773_v20 = vadd.f32 %v1876_v16, %v671_v19 }
 0xe7f   :  { %v1375_v26 = vmul.f32 -1.442695, %v849_v24 }
 0xe81   :  { %1620 = vpow2.f32 %v1375_v26 }
 0xe8b   :  { %v1621_v27 = vpop.eup %1620 }
 0xe8c   :  { %v853_v28 = vadd.f32 1.0, %v1621_v27 }
 0xe8e   :  { %1622 = vrcp.f32 %v853_v28 }
 0xe98   :  { %v1623_v12 = vpop.eup %1622 }
 0xe99   :  { %v867_v34 = vsub.f32 1.0, %v1623_v12  ;;  %v873_v36 = vmul.f32 %v1623_v12, %v1876_v16  ;;  %v1133_v16 = vld [vmem:[#allocation3 + $0x60] sm:$0xff] }
 0xeef   :  { %v858_v29 = vpop.permute.xlu0 %857 }
 0xef0   :  { %v860_v30 = vmul.f32 %v1623_v12, %v858_v29 }
 0xef2   :  { %862 = vrot.lane.b32.xlu1 %v860_v30, %s1701_s8  ;;  %v1571_v30 = vpack.c.bf16 %v1133_v16, %v1132_v50 }
 0xf64   :  { %v863_v31 = vpop.permute.xlu1 %862 }
 0xf65   :  { %v865_v32 = vadd.f32 %v863_v31, %v249_v23  ;;  %v1134_v31 = vld [vmem:[#allocation3 + $0x68] sm:$0xff] }
 0xf67   :  { %1624 = vtanh.f32 %v865_v32  ;;  %v1135_v32 = vld [vmem:[#allocation3 + $0x70] sm:$0xff] }
 0xf71   :  { %v1625_v33 = vpop.eup %1624 }
 0xf72   :  { %869 = vrot.lane.b32.xlu0 %v1625_v33, %s1702_s9  ;;  %v1574_v33 = vpack.c.bf16 %v1135_v32, %v1134_v31  ;;  %v1384_v31 = vld [vmem:[#allocation3 + $0x80] ss:$0 sm:$0xff] }
 0xfe4   :  { %v870_v35 = vpop.permute.xlu0 %869 }
 0xfe5   :  { %v872_v37 = vmul.f32 %v870_v35, %v867_v34  ;;  %v1353_v34 = vld [vmem:[#allocation3 + $0x38] ss:$0 sm:$0xff] }
 0xfe6   :  { %v112_v35 = vadd.f32 %v1353_v34, %v1775_v14 }
 0xfe7   :  { %v874_v39 = vadd.f32 %v873_v36, %v872_v37 }
 0xfe9   :  { %877 = vrot.lane.b32.xlu1 %v874_v39, %s1702_s9  ;;  %v875_v24 = vadd.f32 %v874_v39, %v773_v20 }
0x105b   :  { %v878_v40 = vpop.permute.xlu1 %877 }
0x105c   :  { %1505 = vmatmul.mubr.msk.f32.vlgmr.msra.gmra.mrb[10].mxu1 %vm41_vm1, %v878_v40 }
0x105d   :  { %1526 = vmatprep.mubr.msk.f32.mxu1 %vm1698_vm0, %v1699_v1  ;;  %1569 = vmatpush3.bf16.msra.mxu1 %v1568_v25 }
0x105e   :  { %1570 = vmatprep.subr.bf16.mxu1 %v1697_v0 }
0x1061   :  { %1572 = vmatpush3.bf16.msra.mxu1 %v1571_v30 }
0x1062   :  { %1573 = vmatprep.subr.bf16.mxu1 %v1697_v0 }
0x1065   :  { %1575 = vmatpush3.bf16.msra.mxu1 %v1574_v33  ;;  %v1385_v33 = vld [vmem:[#allocation3 + $0x81] ss:$0 sm:$0xff] }
0x112f   :  { %v947_v41 = vpop.f32.mrb[10].mxu1 }
0x1130   :  { %v948_v42 = vadd.f32 %v1777_v17, %v947_v41  ;;  %v1506_v43 = vpop.f32.mrb[11].mxu1 }
0x1132   :  { %959 = vrot.lane.b32.xlu0 %v948_v42, %s1700_s2  ;;  %v951_v45 = vadd.f32 %v948_v42, %v254_v44 }
0x1134   :  { %v1377_v46 = vmul.f32 -1.442695, %v951_v45 }
0x1136   :  { %1626 = vpow2.f32 %v1377_v46 }
0x1140   :  { %v1627_v47 = vpop.eup %1626 }
0x1141   :  { %v955_v48 = vadd.f32 1.0, %v1627_v47 }
0x1143   :  { %1628 = vrcp.f32 %v955_v48 }
0x114d   :  { %v1629_v49 = vpop.eup %1628 }
0x114e   :  { %v969_v58 = vsub.f32 1.0, %v1629_v49  ;;  %v975_v54 = vmul.f32 %v1629_v49, %v874_v39 }
0x11a4   :  { %v960_v51 = vpop.permute.xlu0 %959 }
0x11a5   :  { %v962_v52 = vmul.f32 %v1629_v49, %v960_v51 }
0x11a7   :  { %964 = vrot.lane.b32.xlu1 %v962_v52, %s1701_s8 }
0x1219   :  { %v965_v55 = vpop.permute.xlu1 %964 }
0x121a   :  { %v967_v56 = vadd.f32 %v965_v55, %v254_v44 }
0x121c   :  { %1630 = vtanh.f32 %v967_v56 }
0x1226   :  { %v1631_v57 = vpop.eup %1630 }
0x1227   :  { %971 = vrot.lane.b32.xlu0 %v1631_v57, %s1702_s9 }
0x1299   :  { %v972_v59 = vpop.permute.xlu0 %971 }
0x129a   :  { %v974_v61 = vmul.f32 %v972_v59, %v969_v58 }
0x129c   :  { %v976_v62 = vadd.f32 %v975_v54, %v974_v61 }
0x129e   :  { %979 = vrot.lane.b32.xlu1 %v976_v62, %s1702_s9  ;;  %v977_v12 = vadd.f32 %v976_v62, %v875_v24 }
0x1310   :  { %v980_v63 = vpop.permute.xlu1 %979 }
0x1311   :  { %1512 = vmatmul.mubr.msk.f32.vlgmr.msra.gmra.mrb[12].mxu0 %vm41_vm1, %v980_v63 }
0x1312   :  { %1533 = vmatprep.mubr.msk.f32.mxu0 %vm1698_vm0, %v1699_v1 }
0x13e4   :  { %v1049_v2 = vpop.f32.mrb[12].mxu0 }
0x13e5   :  { %v1050_v3 = vadd.f32 %v1777_v17, %v1049_v2  ;;  %v1513_v4 = vpop.f32.mrb[13].mxu0  ;;  %v1380_v2 = vld [vmem:[#allocation3 + $0x40] ss:$0 sm:$0xff] }
0x13e6   :  { %v1381_v4 = vld [vmem:[#allocation3 + $0x41] ss:$0 sm:$0xff] }
0x13e7   :  { %1061 = vrot.lane.b32.xlu0 %v1050_v3, %s1700_s2  ;;  %v1053_v6 = vadd.f32 %v1050_v3, %v259_v5 }
0x13e9   :  { %v1379_v7 = vmul.f32 -1.442695, %v1053_v6 }
0x13eb   :  { %1632 = vpow2.f32 %v1379_v7  ;;  %v1248_v7 = vld [vmem:[#allocation3 + $0x88] sm:$0xff] }
0x13f5   :  { %v1633_v8 = vpop.eup %1632 }
0x13f6   :  { %v1057_v9 = vadd.f32 1.0, %v1633_v8  ;;  %v1249_v8 = vld [vmem:[#allocation3 + $0x90] sm:$0xff] }
0x13f8   :  { %1634 = vrcp.f32 %v1057_v9  ;;  %v1577_v9 = vpack.c.bf16 %v1249_v8, %v1248_v7 }
0x13fa   :  { %1578 = vmatpush3.bf16.msra.mxu0 %v1577_v9 }
0x1402   :  { %v1635_v10 = vpop.eup %1634 }
0x1403   :  { %v1071_v21 = vsub.f32 1.0, %v1635_v10  ;;  %v1077_v26 = vmul.f32 %v1635_v10, %v976_v62 }
0x1459   :  { %v1062_v13 = vpop.permute.xlu0 %1061 }
0x145a   :  { %v1064_v15 = vmul.f32 %v1635_v10, %v1062_v13  ;;  %v1382_v10 = vld [vmem:[#allocation3 + $0x78] ss:$0 sm:$0xff] }
0x145c   :  { %1066 = vrot.lane.b32.xlu1 %v1064_v15, %s1701_s8 }
0x14ce   :  { %v1067_v1 = vpop.permute.xlu1 %1066 }
0x14cf   :  { %v1069_v18 = vadd.f32 %v1067_v1, %v259_v5 }
0x14d1   :  { %1636 = vtanh.f32 %v1069_v18 }
0x14db   :  { %v1637_v17 = vpop.eup %1636 }
0x14dc   :  { %1073 = vrot.lane.b32.xlu0 %v1637_v17, %s1702_s9 }
0x14e0   :  { %1085 = vrot.lane.b32.xlu0 %v1751_v11, %s1703_s1  ;;  %v33_v11 = vld [vmem:[%s1944_s0] sm:$0xff]  ;;  %s1704_s0 = smov [#allocation6]  }
0x14e1   :  { %s1344_s24 = sshll.u32 %s1704_s0, 4  ;;  %s1345_s24 = int_to_ptr.vmem [resolvable:$true] %s1344_s24 }
0x14e2   :  { %s1668_s25 = scalar_lea.vmem %s1345_s24, 128  ;;  %p1673_p9 = scmp.lt.s32.totalorder %s1345_s24, %s1345_s24 }
0x14e3   :  { %p1669_p8 = scmp.ne.s32.totalorder %s1345_s24, %s1668_s25  ;;  %p1674_p10 = scmp.lt.s32.totalorder %s1668_s25, %s1668_s25 }
0x14e5   :  { %p1675_p11 = por %p1674_p10, %p1673_p9 }
0x14e7   :  { %p1676_p12 = pnand %p1675_p11, %p1669_p8 }
0x154e   :  { %v1074_v23 = vpop.permute.xlu0 %1073 }
0x154f   :  { %v1076_v27 = vmul.f32 %v1074_v23, %v1071_v21 }
0x1551   :  { %v1078_v28 = vadd.f32 %v1077_v26, %v1076_v27 }
0x1552   :  { %v1086_v37 = vpop.permute.xlu0 %1085 }
0x1553   :  { %v1079_v29 = vadd.f32 %v1078_v28, %v977_v12 }
0x1555   :  { %1081 = vrot.lane.b32.xlu1 %v1079_v29, %s1702_s9 }
0x1559   :  { %1089 = vrot.lane.b32.xlu1 %v33_v11, %s1701_s8 }
0x15c7   :  { %v1082_v36 = vpop.permute.xlu1 %1081 }
0x15c8   :  { %v1084_v39 = vmul.f32 %v1082_v36, %v112_v35  ;;  %v1386_v36 = vld [vmem:[#allocation3 + $0x98] ss:$0 sm:$0xff] }
0x15ca   :  { %v1092_v40 = vsel %vm41_vm1, %v1084_v39, %v1086_v37 }
0x15cb   :  { %v1090_v41 = vpop.permute.xlu1 %1089 }
0x15cc   :  { %v1094_v42 = vsel %vm1093_vm2, %v1092_v40, %v1090_v41 }
0x15cd   :  { %v1098_v43 = vsel %vm1097_vm3, %v1094_v42, 0.0 }
0x15ce   :  { %v1099_v44 = vrot.slane %v1098_v43, 4 }
0x15d0   :  { %v1100_v0 = vadd.f32 %v1099_v44, %v1098_v43 }
0x15d2   :  { %v1101_v45 = vrot.slane %v1100_v0, 2 }
0x15d4   :  { %v1102_v46 = vadd.f32 %v1101_v45, %v1100_v0 }
0x15d6   :  { %v1103_v47 = vrot.slane %v1102_v46, 1 }
0x15d8   :  { %v1104_v48 = vadd.f32 %v1103_v47, %v1102_v46 }
0x15da   :  { %v1106_v49 = vmul.f32 0.125, %v1104_v48 }
0x15dc   :  { %v1107_v51 = vsub.f32 %v1094_v42, %v1106_v49 }
0x15de   :  { %v1108_v14 = vmul.f32 %v1107_v51, %v1107_v51 }
0x15e0   :  { %v1109_v52 = vsel %vm1097_vm3, %v1108_v14, 0.0 }
0x15e1   :  { %v1110_v55 = vrot.slane %v1109_v52, 4 }
0x15e3   :  { %v1111_v56 = vadd.f32 %v1110_v55, %v1109_v52 }
0x15e5   :  { %v1112_v57 = vrot.slane %v1111_v56, 2 }
0x15e7   :  { %v1113_v58 = vadd.f32 %v1112_v57, %v1111_v56 }
0x15e9   :  { %v1114_v59 = vrot.slane %v1113_v58, 1 }
0x15eb   :  { %v1115_v54 = vadd.f32 %v1114_v59, %v1113_v58 }
0x15ed   :  { %v1116_v61 = vmul.f32 0.125, %v1115_v54 }
0x15ef   :  { %v1117_v62 = vadd.f32 1e-05, %v1116_v61 }
0x15f1   :  { %1638 = vrsqrt.f32 %v1117_v62 }
0x15fb   :  { %v1639_v63 = vpop.eup %1638 }
0x15fc   :  { %v1119_v3 = vmul.f32 %v1639_v63, %v1107_v51 }
0x15fe   :  { %v1124_v5 = vmul.f32 %v1380_v2, %v1119_v3 }
0x1600   :  { %v1129_v6 = vadd.f32 %v1381_v4, %v1124_v5 }
0x1602   :  { %1527 = vmatmul.mubr.msk.f32.vlgmr.msra.gmra.mrb[12].mxu1 %vm1097_vm3, %v1129_v6 }
0x16d5   :  { %v1210_v13 = vpop.f32.mrb[12].mxu1 }
0x16d6   :  { %v1211_v15 = vadd.f32 %v1382_v10, %v1210_v13  ;;  %v1528_v1 = vpop.f32.mrb[13].mxu1 }
0x16d8   :  { %v1214_v18 = vmax.f32 %v1211_v15, 0.0 }
0x16da   :  { %v1217_v17 = vsel %vm41_vm1, %v1214_v18, 0.0 }
0x16db   :  { %v1218_v22 = vrot.slane %v1217_v17, 4 }
0x16dd   :  { %v1219_v53 = vadd.f32 %v1218_v22, %v1217_v17 }
0x16df   :  { %v1220_v19 = vrot.slane %v1219_v53, 2 }
0x16e1   :  { %v1221_v20 = vadd.f32 %v1220_v19, %v1219_v53 }
0x16e3   :  { %v1222_v21 = vrot.slane %v1221_v20, 1 }
0x16e5   :  { %v1223_v23 = vadd.f32 %v1222_v21, %v1221_v20 }
0x16e7   :  { %v1224_v24 = vmul.f32 0.125, %v1223_v23 }
0x16e9   :  { %v1225_v26 = vsub.f32 %v1214_v18, %v1224_v24 }
0x16eb   :  { %v1226_v27 = vmul.f32 %v1225_v26, %v1225_v26 }
0x16ed   :  { %v1227_v28 = vsel %vm41_vm1, %v1226_v27, 0.0 }
0x16ee   :  { %v1228_v12 = vrot.slane %v1227_v28, 4 }
0x16f0   :  { %v1229_v29 = vadd.f32 %v1228_v12, %v1227_v28 }
0x16f2   :  { %v1230_v11 = vrot.slane %v1229_v29, 2 }
0x16f4   :  { %v1231_v38 = vadd.f32 %v1230_v11, %v1229_v29 }
0x16f6   :  { %v1232_v60 = vrot.slane %v1231_v38, 1 }
0x16f8   :  { %v1233_v25 = vadd.f32 %v1232_v60, %v1231_v38 }
0x16fa   :  { %v1234_v50 = vmul.f32 0.125, %v1233_v25 }
0x16fc   :  { %v1235_v16 = vadd.f32 1e-05, %v1234_v50 }
0x16fe   :  { %1640 = vrsqrt.f32 %v1235_v16 }
0x1708   :  { %v1641_v30 = vpop.eup %1640 }
0x1709   :  { %v1237_v32 = vmul.f32 %v1641_v30, %v1225_v26 }
0x170b   :  { %v1242_v34 = vmul.f32 %v1384_v31, %v1237_v32 }
0x170d   :  { %v1247_v35 = vadd.f32 %v1385_v33, %v1242_v34 }
0x170f   :  { %1534 = vmatmul.mubr.msk.f32.vlgmr.msra.gmra.mrb[14].mxu0 %vm41_vm1, %v1247_v35 }
0x17e2   :  { %v1324_v37 = vpop.f32.mrb[14].mxu0 }
0x17e3   :  { %v1325_v39 = vadd.f32 %v1386_v36, %v1324_v37  ;;  %v1535_v40 = vpop.f32.mrb[15].mxu0 }
0x17e5   :  { %1328 = vmax.xlane.f32.xlu0 %v1325_v39 }
0x1872   :  { %v1329_v41 = vpop.xlane.xlu0 %1328 }
0x1873   :  { %v1330_v42 = vsub.f32 %v1325_v39, %v1329_v41 }
0x1875   :  { %v1331_v43 = vmul.f32 1.442695, %v1330_v42 }
0x1877   :  { %1642 = vpow2.f32 %v1331_v43 }
0x1881   :  { %v1643_v44 = vpop.eup %1642 }
0x1882   :  { %1333 = vadd.xlane.f32.xlu1 %v1643_v44 }
0x190f   :  { %v1334_v0 = vpop.xlane.xlu1 %1333 }
0x1910   :  { %1644 = vrcp.f32 %v1334_v0 }
0x191a   :  { %v1645_v45 = vpop.eup %1644 }
0x191b   :  { %v1336_v46 = vmul.f32 %v1645_v45, %v1643_v44 }
0x191d   :  { %1337 = vst [vmem:[#allocation6] sm:$0xff] %v1336_v46 }
0x191e   :  { %1679 = shalt.err (!%p1676_p12)
}
0x191f   :  { %s1680_s28 = scalar_lea.hbm %s1948_s4, 128 }
0x1920   :  { %p1681_p13 = scmp.ne.s32.totalorder %s1948_s4, %s1680_s28  ;;  %p1684_p0 = scmp.lt.u32.totalorder %s1680_s28, %s1948_s4 }
0x1922   :  { %p1686_p1 = pnand %p1684_p0, %p1681_p13 }
0x1924   :  { %1689 = shalt.err (!%p1686_p1)
}
0x1925   :  { %1347 = dma.vmem_to_hbm [thread:$0]  %s1345_s24, 128, %s1948_s4, [#allocation5]  }
0x1926   :  { %1692 = dma.done.wait [#allocation5], 128  }
0x1927   :  { %1693 = vsyncadd [#allocation5], 4294967168 }
0x1928   :  { %1351 = vsyncpa [#allocation4], 1 }
0x1929   :  { %1352 = vsyncpa [#allocation5], 1 }

</bundles_post_ra>
